<compile_context>
chip_gen: v7x
topology: tpu7x:2x2x1
jax: 0.10.0
libtpu: 0.0.40
codegen_flags: <defaults>
</compile_context>

<pallas_src>
import functools

import jax
import jax.numpy as jnp
from jax.experimental import pallas as pl
from jax.experimental.pallas import tpu as pltpu

_LANES = 128
_VMEM_LIMIT_BYTES = 32 * 1024 * 1024   # worst case live blocks ~16 MiB; 2x headroom


def _sum_kernel(x_ref, prev_ref, o_ref, *, d, tile, prev_w, total):
    """Per-tile partial of sum_j |flat[j] - flat[j-d]| over valid j (d <= j < total).

    x_ref:    (1, tile)   lanes [i*tile, (i+1)*tile) of the flat (1, T*D) input
    prev_ref: (1, prev_w) lanes ending right at i*tile (overlap window; carry-free)
    o_ref:    (1, 8, 128) this tile's output block; partial written one-hot at [0,0,0]
    """
    i = pl.program_id(0)
    x = x_ref[...].astype(jnp.float32)
    prev = prev_ref[...].astype(jnp.float32)

    # shifted[j] == flat[i*tile + j - d]; the first d lanes come from the overlap block,
    # so there is no cross-tile carry and tiles can run in parallel.
    shifted = jnp.concatenate([prev[:, prev_w - d:], x[:, : tile - d]], axis=1)
    absdiff = jnp.abs(x - shifted)

    # Single mask handles (a) the zero-loss first frame (global index < d) and
    # (b) undefined lanes of the ragged last tile (global index >= total).
    lane = jax.lax.broadcasted_iota(jnp.int32, (1, tile), 1)
    glob = lane + i * tile
    valid = (glob >= d) & (glob < total)
    partial = jnp.sum(jnp.where(valid, absdiff, 0.0))

    # One full, aligned (8,128) store per tile; only element [0,0] is non-zero so the
    # wrapper's jnp.sum over all partial blocks equals the sum of the partials.
    r = jax.lax.broadcasted_iota(jnp.int32, (1, 8, _LANES), 1)
    c = jax.lax.broadcasted_iota(jnp.int32, (1, 8, _LANES), 2)
    o_ref[...] = jnp.where((r == 0) & (c == 0), partial, 0.0)


def _none_kernel(x_ref, prev_ref, o_ref, *, tile, prev_w, scale):
    """Per-frame loss for one lane tile of the (D, T) transposed input.

    x_ref:    (D, tile)   frames [i*tile, (i+1)*tile)
    prev_ref: (D, prev_w) frames ending right at i*tile (last column = previous frame)
    o_ref:    (1, tile)   lane-dense per-frame loss slab
    """
    i = pl.program_id(0)
    x = x_ref[...].astype(jnp.float32)
    prev = prev_ref[...].astype(jnp.float32)

    # shifted[:, t] == frame t-1; lane 0 comes from the overlap block (carry-free).
    shifted = jnp.concatenate([prev[:, prev_w - 1:], x[:, : tile - 1]], axis=1)
    per = jnp.sum(jnp.abs(x - shifted), axis=0, keepdims=True)   # (1, tile) sublane add

    lane = jax.lax.broadcasted_iota(jnp.int32, (1, tile), 1)
    glob = lane + i * tile
    per = jnp.where(glob == 0, 0.0, per)        # frame 0 has zero loss
    o_ref[...] = per * scale                    # one vector-wide scale multiply


def smooth_translation_loss(translation, loss_weight=1.0, reduction='mean',
                            max_tile_lanes=131072):
    """Pallas implementation of SmoothTranslationLoss.forward.

    translation: (T, D) array (typically D == 3).
    Returns a scalar for 'mean'/'sum', or a (T,) float32 array for 'none'.
    """
    assert reduction in (None, 'none', 'mean', 'sum')
    T, D = translation.shape
    scale = 1000.0 * float(loss_weight)

    if T <= 1:
        # No temporal diffs: the loss is identically zero.
        if reduction in ('mean', 'sum'):
            return jnp.zeros((), jnp.float32)
        return jnp.zeros((T,), jnp.float32)

    assert max_tile_lanes % _LANES == 0
    assert D <= _LANES, "feature dim must fit inside the 128-lane overlap window"

    dims = ("parallel",)   # tiles are independent -> shardable across v7x's 2 TCs

    if reduction in ('mean', 'sum'):
        # Flat, row-major view: free reshape, no transpose / pad HBM passes.
        L = T * D
        flat = translation.reshape(1, L)
        if L <= max_tile_lanes:
            tile, num_tiles = L, 1
        else:
            tile, num_tiles = max_tile_lanes, pl.cdiv(L, max_tile_lanes)
        bpt = tile // _LANES
        main_spec = pl.BlockSpec((1, tile), lambda i: (0, i))
        if num_tiles == 1:
            prev_spec, prev_w = pl.BlockSpec((1, tile), lambda i: (0, 0)), tile
        else:
            prev_spec = pl.BlockSpec(
                (1, _LANES), lambda i: (0, jnp.maximum(i * bpt - 1, 0)))
            prev_w = _LANES

        kernel = functools.partial(_sum_kernel, d=D, tile=tile, prev_w=prev_w, total=L)
        partials = pl.pallas_call(
            kernel,
            out_shape=jax.ShapeDtypeStruct((num_tiles, 8, _LANES), jnp.float32),
            grid=(num_tiles,),
            in_specs=[main_spec, prev_spec],
            out_specs=pl.BlockSpec((1, 8, _LANES), lambda i: (i, 0, 0)),
            compiler_params=pltpu.CompilerParams(
                dimension_semantics=dims, vmem_limit_bytes=_VMEM_LIMIT_BYTES),
        )(flat, flat)

        total = jnp.sum(partials)               # tiny (num_tiles one-hot blocks)
        final_scale = scale / T if reduction == 'mean' else scale
        return total * final_scale              # single scalar multiply folds 1000*lw (/T)

    # reduction == 'none' / None: per-frame output wants time on lanes.
    # TODO(synk): the (T, D) -> (D, T) transpose is one extra small HBM pass; fuse it
    # into the upstream producer when this loss is embedded inside a larger jit.
    xT = jnp.transpose(translation)             # (D, T)
    if T <= max_tile_lanes:
        tile, num_tiles = T, 1
    else:
        tile, num_tiles = max_tile_lanes, pl.cdiv(T, max_tile_lanes)
    bpt = tile // _LANES
    main_spec = pl.BlockSpec((D, tile), lambda i: (0, i))
    if num_tiles == 1:
        prev_spec, prev_w = pl.BlockSpec((D, tile), lambda i: (0, 0)), tile
    else:
        prev_spec = pl.BlockSpec(
            (D, _LANES), lambda i: (0, jnp.maximum(i * bpt - 1, 0)))
        prev_w = _LANES

    kernel = functools.partial(_none_kernel, tile=tile, prev_w=prev_w, scale=scale)
    out = pl.pallas_call(
        kernel,
        out_shape=jax.ShapeDtypeStruct((1, T), jnp.float32),
        grid=(num_tiles,),
        in_specs=[main_spec, prev_spec],
        out_specs=pl.BlockSpec((1, tile), lambda i: (0, i)),
        compiler_params=pltpu.CompilerParams(
            dimension_semantics=dims, vmem_limit_bytes=_VMEM_LIMIT_BYTES),
    )(xT, xT)
    return out[0]


def _reference(translation, loss_weight=1.0, reduction='mean'):
    """Pure-JAX reference mirroring the PyTorch module."""
    t = translation.astype(jnp.float32)
    diff = t[1:] - t[:-1]
    per = jnp.sum(jnp.abs(diff), axis=-1, keepdims=True)
    per = jnp.concatenate([jnp.zeros_like(per[:1]), per], axis=0)
    loss = jnp.sum(per, axis=-1) * 1000.0 * loss_weight
    if reduction == 'mean':
        return loss.mean()
    if reduction == 'sum':
        return loss.sum()
    return loss


if __name__ == "__main__":
    key = jax.random.PRNGKey(0)
    k1, k2 = jax.random.split(key)

    # Typical module usage: (num_frames, 3) body translations.
    t_small = jax.random.normal(k1, (8, 3), dtype=jnp.float32)

    out_mean = jax.block_until_ready(smooth_translation_loss(t_small, 1.0, 'mean'))
    ref_mean = _reference(t_small, 1.0, 'mean')
    assert jnp.allclose(out_mean, ref_mean, rtol=1e-5, atol=1e-5), (out_mean, ref_mean)

    out_sum = jax.block_until_ready(smooth_translation_loss(t_small, 0.5, 'sum'))
    ref_sum = _reference(t_small, 0.5, 'sum')
    assert jnp.allclose(out_sum, ref_sum, rtol=1e-5, atol=1e-5), (out_sum, ref_sum)

    out_none = jax.block_until_ready(smooth_translation_loss(t_small, 2.0, 'none'))
    ref_none = _reference(t_small, 2.0, 'none')
    assert jnp.allclose(out_none, ref_none, rtol=1e-5, atol=1e-5), (out_none, ref_none)

    # Exercise the multi-tile (parallel, carry-free, ragged last tile) paths at small scale.
    t_long = jax.random.normal(k2, (1000, 3), dtype=jnp.float32)

    out_mean_l = jax.block_until_ready(
        smooth_translation_loss(t_long, 1.0, 'mean', max_tile_lanes=256))
    ref_mean_l = _reference(t_long, 1.0, 'mean')
    assert jnp.allclose(out_mean_l, ref_mean_l, rtol=1e-4, atol=1e-3), (out_mean_l, ref_mean_l)

    out_sum_l = jax.block_until_ready(
        smooth_translation_loss(t_long, 1.0, 'sum', max_tile_lanes=256))
    ref_sum_l = _reference(t_long, 1.0, 'sum')
    assert jnp.allclose(out_sum_l, ref_sum_l, rtol=1e-4, atol=1e-2), (out_sum_l, ref_sum_l)

    out_none_l = jax.block_until_ready(
        smooth_translation_loss(t_long, 1.0, 'none', max_tile_lanes=256))
    ref_none_l = _reference(t_long, 1.0, 'none')
    assert jnp.allclose(out_none_l, ref_none_l, rtol=1e-4, atol=1e-3)

    print("KERNEL_OK")
</pallas_src>

<mosaic_0001>
module attributes {stable_mosaic.version = 11 : i64} {
  func.func @_sum_kernel(%arg0: i32, %arg1: memref<1x24xf32, #tpu.memory_space<vmem>>, %arg2: memref<1x24xf32, #tpu.memory_space<vmem>>, %arg3: memref<1x8x128xf32, #tpu.memory_space<vmem>>) attributes {dimension_semantics = [#tpu.dimension_semantics<parallel>], iteration_bounds = array<i64: 1>, scalar_prefetch = 0 : i64, scratch_operands = 0 : i64, tpu.core_type = #tpu.core_type<tc>, window_params = [{transform_indices = @transform_0, window_bounds = array<i64: 1, 24>}, {pipeline_mode = #tpu.pipeline_mode<synchronous>, transform_indices = @transform_1, window_bounds = array<i64: 1, 24>}, {transform_indices = @transform_2, window_bounds = array<i64: 1, 8, 128>}]} {
    %c0 = arith.constant 0 : index
    %c0_0 = arith.constant 0 : index
    %0 = vector.load %arg1[%c0, %c0_0] : memref<1x24xf32, #tpu.memory_space<vmem>>, vector<1x24xf32>
    %c0_1 = arith.constant 0 : index
    %c0_2 = arith.constant 0 : index
    %1 = vector.load %arg2[%c0_1, %c0_2] : memref<1x24xf32, #tpu.memory_space<vmem>>, vector<1x24xf32>
    %2 = vector.extract_strided_slice %1 {offsets = [0, 21], sizes = [1, 3], strides = [1, 1]} : vector<1x24xf32> to vector<1x3xf32>
    %3 = vector.extract_strided_slice %0 {offsets = [0, 0], sizes = [1, 21], strides = [1, 1]} : vector<1x24xf32> to vector<1x21xf32>
    %4 = tpu.concatenate %2, %3 in 1 : vector<1x3xf32>, vector<1x21xf32> -> vector<1x24xf32>
    %5 = arith.subf %0, %4 : vector<1x24xf32>
    %6 = math.absf %5 : vector<1x24xf32>
    %7 = tpu.iota {dimensions = array<i32: 1>} : vector<1x24xi32>
    %c24_i32 = arith.constant 24 : i32
    %8 = arith.muli %arg0, %c24_i32 : i32
    %9 = vector.broadcast %8 : i32 to vector<1x24xi32>
    %10 = arith.addi %7, %9 : vector<1x24xi32>
    %c3_i32 = arith.constant 3 : i32
    %11 = vector.broadcast %c3_i32 : i32 to vector<1x24xi32>
    %12 = arith.cmpi sge, %10, %11 : vector<1x24xi32>
    %c24_i32_3 = arith.constant 24 : i32
    %13 = vector.broadcast %c24_i32_3 : i32 to vector<1x24xi32>
    %14 = arith.cmpi slt, %10, %13 : vector<1x24xi32>
    %15 = arith.andi %12, %14 : vector<1x24xi1>
    %cst = arith.constant 0.000000e+00 : f32
    %16 = vector.broadcast %cst : f32 to vector<1x24xf32>
    %17 = arith.select %15, %6, %16 : vector<1x24xi1>, vector<1x24xf32>
    %18 = vector.shape_cast %17 : vector<1x24xf32> to vector<1x1x24xf32>
    %cst_4 = arith.constant dense<0.000000e+00> : vector<1xf32>
    %19 = vector.multi_reduction <add>, %18, %cst_4 [1, 2] : vector<1x1x24xf32> to vector<1xf32>
    %20 = vector.shape_cast %19 : vector<1xf32> to vector<1x1x1xf32>
    %21 = vector.extract %20[0, 0, 0] : f32 from vector<1x1x1xf32>
    %22 = tpu.iota {dimensions = array<i32: 1>} : vector<1x8x128xi32>
    %23 = tpu.iota {dimensions = array<i32: 2>} : vector<1x8x128xi32>
    %c0_i32 = arith.constant 0 : i32
    %24 = vector.broadcast %c0_i32 : i32 to vector<1x8x128xi32>
    %25 = arith.cmpi eq, %22, %24 : vector<1x8x128xi32>
    %c0_i32_5 = arith.constant 0 : i32
    %26 = vector.broadcast %c0_i32_5 : i32 to vector<1x8x128xi32>
    %27 = arith.cmpi eq, %23, %26 : vector<1x8x128xi32>
    %28 = arith.andi %25, %27 : vector<1x8x128xi1>
    %cst_6 = arith.constant 0.000000e+00 : f32
    %29 = vector.broadcast %21 : f32 to vector<1x8x128xf32>
    %30 = vector.broadcast %cst_6 : f32 to vector<1x8x128xf32>
    %31 = arith.select %28, %29, %30 : vector<1x8x128xi1>, vector<1x8x128xf32>
    %c0_7 = arith.constant 0 : index
    %c0_8 = arith.constant 0 : index
    %c0_9 = arith.constant 0 : index
    %32 = vector.load %arg3[%c0_7, %c0_8, %c0_9] : memref<1x8x128xf32, #tpu.memory_space<vmem>>, vector<1x8x128xf32>
    tpu.vector_store %arg3[%c0_7, %c0_8, %c0_9], %31 {strides = array<i32>} : memref<1x8x128xf32, #tpu.memory_space<vmem>>, vector<1x8x128xf32>,
    return
  }
  func.func @transform_0(%arg0: i32) -> (i32, i32) {
    %c0_i32 = arith.constant 0 : i32
    %c0_i32_0 = arith.constant 0 : i32
    return %c0_i32, %arg0 : i32, i32
  }
  func.func @transform_1(%arg0: i32) -> (i32, i32) {
    %c0_i32 = arith.constant 0 : i32
    %c0_i32_0 = arith.constant 0 : i32
    %c0_i32_1 = arith.constant 0 : i32
    return %c0_i32, %c0_i32_0 : i32, i32
  }
  func.func @transform_2(%arg0: i32) -> (i32, i32, i32) {
    %c0_i32 = arith.constant 0 : i32
    %c0_i32_0 = arith.constant 0 : i32
    %c0_i32_1 = arith.constant 0 : i32
    return %arg0, %c0_i32, %c0_i32_0 : i32, i32, i32
  }
}

</mosaic_0001>

<bundles_post_ra>
// kernel: tpu_custom_call.1
= control target key start
LH: loop header
LB: loop body
LE: loop exit
PB: predicated region body
PF: predicated region fallthrough
CT: control target
= control target key end

     0   :  { %7 = vsyncpa [#allocation3], 0  ;;  %s190_s0 = inlined_call_operand.hbm [shape: f32[1,24], index: 0, kind: input, shape index: {}]   ;;  %s191_s1 = inlined_call_operand.vmem [shape: f32[1,24], index: 1, kind: input, shape index: {}]   ;;  %s192_s2 = inlined_call_operand.hbm [shape: f32[1,8,128], index: 2, kind: output, shape index: {}]  }
   0x1   :  { %8 = vsyncpa [#allocation4], 0  ;;  %s144_s9 = smov [#allocation2]   ;;  %s96_s13 = scalar_lea.hbm %s190_s0, 16 }
   0x2   :  { %s15_s10 = sshll.u32 %s144_s9, 4  ;;  %p97_p0 = scmp.ne.s32.totalorder %s190_s0, %s96_s13  ;;  %s16_s10 = int_to_ptr.vmem [resolvable:$true] %s15_s10 }
   0x3   :  { %p100_p1 = scmp.lt.u32.totalorder %s96_s13, %s190_s0 }
   0x5   :  { %p102_p2 = pnand %p100_p1, %p97_p0 }
   0x7   :  { %105 = shalt.err (!%p102_p2)
}
   0x8   :  { %s106_s18 = scalar_lea.vmem %s16_s10, 16  ;;  %s110_s19 = scalar_lea.vmem %s16_s10, 32 }
   0x9   :  { %p107_p3 = scmp.ne.s32.totalorder %s16_s10, %s106_s18  ;;  %p111_p4 = scmp.lt.s32.totalorder %s16_s10, %s16_s10 }
   0xa   :  { %p112_p5 = scmp.lt.s32.totalorder %s110_s19, %s106_s18 }
   0xc   :  { %p113_p6 = por %p112_p5, %p111_p4 }
   0xe   :  { %p114_p7 = pnand %p113_p6, %p107_p3 }
  0x10   :  { %117 = shalt.err (!%p114_p7)
}
  0x11   :  { %18 = dma.hbm_to_vmem [thread:$0]  %s190_s0, 16, %s16_s10, [#allocation3]  }
  0x12   :  { %140 = dma.done.wait [#allocation3], 16  }
  0x13   :  { %141 = vsyncadd [#allocation3], 4294967280  ;;  %v35_v0 = vlaneseq  ;;  %v89_v3 = vld [vmem:[%s191_s1] ss:$0 sm:$0xff]  ;;  %s145_s24 = smov 107   ;;  %s146_s25 = smov 3  }
  0x14   :  { %v24_v4 = vld [vmem:[#allocation2] sm:$0x1]  ;;  %31 = vrot.lane.b32.xlu0 %v89_v3, %s145_s24  ;;  %vm42_vm0 = vcmask 23552   ;;  %vm55_vm4 = vcmask 188416   ;;  %s147_s0 = smov [#allocation5]  }
  0x15   :  { %v36_v1 = vshrl.u32 %v35_v0, 7  ;;  %v47_v7 = vand.u32 127, %v35_v0  ;;  %s80_s1 = sshll.u32 %s147_s0, 4  ;;  %s81_s1 = int_to_ptr.vmem [resolvable:$true] %s80_s1 }
  0x16   :  { %s118_s27 = scalar_lea.vmem %s81_s1, 128  ;;  %p123_p9 = scmp.lt.s32.totalorder %s81_s1, %s81_s1 }
  0x17   :  { %v37_v2 = vsub.s32 0, %v36_v1  ;;  %vm51_vm1 = vcmp.ge.s32.totalorder %v47_v7, 3  ;;  %vm52_vm2 = vcmp.lt.s32.totalorder %v47_v7, 24  ;;  %vm68_vm5 = vcmp.eq.s32.totalorder %v36_v1, 0  ;;  %p119_p8 = scmp.ne.s32.totalorder %s81_s1, %s118_s27  ;;  %p124_p10 = scmp.lt.s32.totalorder %s118_s27, %s118_s27 }
  0x18   :  { %vm53_vm3 = vmand %vm51_vm1, %vm52_vm2  ;;  %vm69_vm6 = vcmp.eq.s32.totalorder %v47_v7, 0 }
  0x19   :  { %v38_v5 = vrot.slane %v24_v4, %v37_v2  ;;  %vm70_vm7 = vmand %vm68_vm5, %vm69_vm6  ;;  %p125_p11 = por %p124_p10, %p123_p9 }
  0x1b   :  { %39 = vrot.lane.b32.xlu0 %v38_v5, %s146_s25  ;;  %p126_p12 = pnand %p125_p11, %p119_p8 }
  0x86   :  { %v32_v6 = vpop.permute.xlu0 %31 }
  0x8d   :  { %v40_v8 = vpop.permute.xlu0 %39 }
  0x8e   :  { %v43_v9 = vsel %vm42_vm0, %v32_v6, %v40_v8 }
  0x8f   :  { %v44_v10 = vsub.f32 %v24_v4, %v43_v9 }
  0x91   :  { %v45_v11 = vand.u32 2147483647, %v44_v10 }
  0x93   :  { %v54_v12 = vsel %vm53_vm3, %v45_v11, 0.0 }
  0x94   :  { %v56_v13 = vsel %vm55_vm4, %v54_v12, 0.0 }
  0x95   :  { %57 = vadd.xlane.f32.xlu1 %v56_v13 }
 0x122   :  { %v58_v14 = vpop.xlane.xlu1 %57 }
 0x123   :  { %v59_v15 = vrot.slane %v58_v14, 4 }
 0x125   :  { %v60_v16 = vadd.f32 %v59_v15, %v58_v14 }
 0x127   :  { %v61_v17 = vrot.slane %v60_v16, 2 }
 0x129   :  { %v62_v18 = vadd.f32 %v61_v17, %v60_v16 }
 0x12b   :  { %v63_v19 = vrot.slane %v62_v18, 1 }
 0x12d   :  { %v64_v20 = vadd.f32 %v63_v19, %v62_v18 }
 0x12f   :  { %90 = vpush %v64_v20 }
 0x160   :  { %s91_s26 = spop %90 }
 0x161   :  { %v71_v21 = vstv %s91_s26 }
 0x162   :  { %v72_v22 = vsel %vm70_vm7, %v71_v21, 0.0 }
 0x163   :  { %73 = vst [vmem:[#allocation5] sm:$0xff] %v72_v22 }
 0x164   :  { %129 = shalt.err (!%p126_p12)
}
 0x165   :  { %s130_s30 = scalar_lea.hbm %s192_s2, 128 }
 0x166   :  { %p131_p13 = scmp.ne.s32.totalorder %s192_s2, %s130_s30  ;;  %p134_p0 = scmp.lt.u32.totalorder %s130_s30, %s192_s2 }
 0x168   :  { %p136_p1 = pnand %p134_p0, %p131_p13 }
 0x16a   :  { %139 = shalt.err (!%p136_p1)
}
 0x16b   :  { %83 = dma.vmem_to_hbm [thread:$0]  %s81_s1, 128, %s192_s2, [#allocation4]  }
 0x16c   :  { %142 = dma.done.wait [#allocation4], 128  }
 0x16d   :  { %143 = vsyncadd [#allocation4], 4294967168 }
 0x16e   :  { %87 = vsyncpa [#allocation3], 1 }
 0x16f   :  { %88 = vsyncpa [#allocation4], 1 }

</bundles_post_ra>
